<compile_context>
chip_gen: v5e
topology: v5e:2x2
jax: 0.10.0
libtpu: 0.0.40
codegen_flags: <defaults>
</compile_context>

<pallas_src>
import functools

import numpy as np
import jax
import jax.numpy as jnp
from jax.experimental import pallas as pl
from jax.experimental.pallas import tpu as pltpu


def _dino_loss_kernel(temp_ref, student_ref, teacher_ref, center_ref,
                      loss_part_ref, tsum_part_ref, *, inv_student_temp, ncrops):
    # temp_ref: SMEM (1,1) f32 -- teacher temperature for this epoch.
    inv_temp = 1.0 / temp_ref[0, 0]                       # one scalar divide per tile

    center = center_ref[...].astype(jnp.float32)          # (1, D)
    teacher = teacher_ref[...].astype(jnp.float32)        # (2, TB, D)

    # Per-tile raw-teacher row sum for the center EMA (lane-dense (1,1,D) store).
    tsum_part_ref[...] = jnp.sum(teacher, axis=(0, 1), keepdims=True)

    # ---- teacher softmax((teacher - center) / temp, axis=-1) ----
    t = (teacher - center) * inv_temp
    t = t - jnp.max(t, axis=-1, keepdims=True)
    et = jnp.exp(t)
    # exact reciprocal on the narrow (2, TB, 1) row sum (approx=True would move it
    # to the EUP at ~1e-3 rel error; kept exact for parity with the reference).
    q = et * pl.reciprocal(jnp.sum(et, axis=-1, keepdims=True), approx=False)
    q0, q1 = q[0], q[1]                                    # (TB, D) each
    q_sum = q0 + q1                                        # (TB, D)
    # Row masses (== 1 / 2 up to rounding): lets the log-softmax normalizer be
    # applied per row instead of per element.
    q0_row = jnp.sum(q0, axis=-1, keepdims=True)           # (TB, 1)
    q1_row = jnp.sum(q1, axis=-1, keepdims=True)
    qs_row = q0_row + q1_row

    # ---- per-crop student pass: two per-row accumulators, tiny live set ----
    #   acc_pair = sum_{iq<2} <q_iq, logp_iq>
    #   acc_all  = <q0 + q1, sum_v logp_v>
    #   CE tile sum = sum_{iq, v != iq} -q_iq . logp_v = acc_pair - acc_all
    acc_pair = jnp.zeros_like(q0_row)
    acc_all = jnp.zeros_like(q0_row)
    for v in range(ncrops):                                # static unroll (small ncrops)
        sv = student_ref[v].astype(jnp.float32) * inv_student_temp   # (TB, D)
        sv = sv - jnp.max(sv, axis=-1, keepdims=True)
        lse = jnp.log(jnp.sum(jnp.exp(sv), axis=-1, keepdims=True))  # (TB, 1)
        # <q, logp_v> = <q, sv> - lse * sum(q)   (reassociated; no (TB,D) subtract)
        acc_all = acc_all + jnp.sum(q_sum * sv, axis=-1, keepdims=True) - lse * qs_row
        if v == 0:
            acc_pair = acc_pair + jnp.sum(q0 * sv, axis=-1, keepdims=True) - lse * q0_row
        elif v == 1:
            acc_pair = acc_pair + jnp.sum(q1 * sv, axis=-1, keepdims=True) - lse * q1_row

    # Sum over rows of this tile and over all (iq, v != iq) pairs; normalization
    # by (batch * n_terms) is hoisted to the wrapper so the grid axis stays parallel.
    ce = jnp.sum(acc_pair - acc_all)
    loss_part_ref[...] = jnp.broadcast_to(ce, loss_part_ref.shape).astype(jnp.float32)


def _vmem_capacity_bytes():
    try:
        return int(pltpu.get_tpu_info().vmem_capacity_bytes)
    except Exception:
        return 64 * 1024 * 1024   # conservative fallback (v7x per-TC VMEM)


def _pick_tile_b(batch, out_dim, ncrops, in_itemsize, vmem_capacity):
    """Largest row tile whose pipelined working set fits ~3/4 of this chip's VMEM,
    keeping >= 2 tiles (v7x dual-TensorCore) and sublane-friendly row counts."""
    budget = (3 * vmem_capacity) // 4                 # 48 MiB (v7x) / 96 MiB (v5e/v6e)
    per_row = ((ncrops + 2) * out_dim * 2 * in_itemsize   # double-buffered input tiles
               + 10 * out_dim * 4)                        # live f32 (row, D) planes
    desired = max(int(budget // max(per_row, 1)), 1)
    if batch >= 16:
        desired = min(desired, batch // 2)            # >= 2 grid tiles -> both v7x TCs
    desired = min(desired, batch)
    mult = max(8, 32 // max(in_itemsize, 1))          # sublane pack: f32 8, bf16 16, i8 32
    best = None
    for tb in range(desired, 7, -1):
        if batch % tb == 0 and tb % 8 == 0:
            if tb % mult == 0:
                return tb
            if best is None:
                best = tb
    if best is not None:
        return best
    # TODO(synk): D-tiled two-pass path needed when even the smallest legal row
    #             tile exceeds the budget (huge out_dim / ncrops).
    return batch                                      # full-extent block is always legal


def dino_loss_pallas(student_output, teacher_output, center, temp, *,
                     ncrops, student_temp, center_momentum, tile_b=None):
    n_student, out_dim = student_output.shape
    batch = n_student // ncrops
    assert ncrops >= 2 and n_student == ncrops * batch
    assert teacher_output.shape == (2 * batch, out_dim)
    assert center.shape == (1, out_dim)

    in_itemsize = jnp.dtype(student_output.dtype).itemsize
    vmem_cap = _vmem_capacity_bytes()
    if tile_b is None:
        tile_b = _pick_tile_b(batch, out_dim, ncrops, in_itemsize, vmem_cap)
    elif batch % tile_b != 0 or (tile_b % 8 != 0 and tile_b != batch):
        tile_b = batch
    num_tiles = batch // tile_b

    student3 = student_output.reshape(ncrops, batch, out_dim)
    teacher3 = teacher_output.reshape(2, batch, out_dim)
    temp_arr = jnp.asarray(temp, jnp.float32).reshape(1, 1)

    kernel = functools.partial(_dino_loss_kernel,
                               inv_student_temp=float(1.0 / student_temp),
                               ncrops=ncrops)

    # Scoped-VMEM limit: double-buffered inputs + live f32 temporaries + slack,
    # clamped below this generation's physical VMEM (64 MiB v7x, 128 MiB v5e/v6e).
    est_bytes = (2 * (ncrops + 2) * tile_b * out_dim * in_itemsize
                 + 12 * tile_b * out_dim * 4
                 + 4 * out_dim * 4
                 + (4 << 20))
    vmem_limit = int(min(max(est_bytes, 32 * 1024 * 1024),
                         vmem_cap - 16 * 1024 * 1024))

    # Advisory cost estimate so XLA overlaps the tiny tail reductions with the kernel.
    elems = (ncrops + 2) * batch * out_dim
    cost = pl.CostEstimate(
        flops=int(12 * elems),
        transcendentals=int(elems),
        bytes_accessed=int(elems * in_itemsize
                           + num_tiles * (128 + out_dim) * 4 + out_dim * 4),
    )

    loss_parts, tsum_parts = pl.pallas_call(
        kernel,
        grid=(num_tiles,),
        in_specs=[
            pl.BlockSpec(memory_space=pltpu.MemorySpace.SMEM),             # temp (1,1)
            pl.BlockSpec((ncrops, tile_b, out_dim), lambda i: (0, i, 0)),  # student
            pl.BlockSpec((2, tile_b, out_dim), lambda i: (0, i, 0)),       # teacher
            pl.BlockSpec((1, out_dim), lambda i: (0, 0)),                  # center
        ],
        out_specs=(
            pl.BlockSpec((1, 1, 128), lambda i: (i, 0, 0)),      # per-tile CE sum
            pl.BlockSpec((1, 1, out_dim), lambda i: (i, 0, 0)),  # per-tile teacher sum
        ),
        out_shape=(
            jax.ShapeDtypeStruct((num_tiles, 1, 128), jnp.float32),
            jax.ShapeDtypeStruct((num_tiles, 1, out_dim), jnp.float32),
        ),
        compiler_params=pltpu.CompilerParams(
            dimension_semantics=("parallel",),   # shard row tiles across v7x's 2 TCs
            vmem_limit_bytes=vmem_limit,
        ),
        cost_estimate=cost,
    )(temp_arr, student3, teacher3, center)

    # Tiny tail reductions on (num_tiles, ...) partials.
    n_terms = 2 * (ncrops - 1)
    loss = jnp.sum(loss_parts[:, 0, 0]) / (batch * n_terms)
    batch_center = jnp.sum(tsum_parts[:, 0, :], axis=0, keepdims=True) / (2 * batch)
    # TODO(synk): dist.all_reduce(batch_center) across devices not implemented.
    new_center = center * center_momentum + batch_center * (1.0 - center_momentum)
    return loss, new_center


class DINOLossPallas:
    """Pallas-backed equivalent of the PyTorch DINOLoss module."""

    def __init__(self, out_dim, ncrops, warmup_teacher_temp, teacher_temp,
                 warmup_teacher_temp_epochs, nepochs,
                 student_temp=0.1, center_momentum=0.9, tile_b=None):
        self.student_temp = student_temp
        self.center_momentum = center_momentum
        self.ncrops = ncrops
        self.out_dim = out_dim
        self.tile_b = tile_b
        self.center = jnp.zeros((1, out_dim), jnp.float32)
        self.teacher_temp_schedule = np.concatenate((
            np.linspace(warmup_teacher_temp, teacher_temp, warmup_teacher_temp_epochs),
            np.ones(nepochs - warmup_teacher_temp_epochs) * teacher_temp,
        ))

    def __call__(self, student_output, teacher_output, epoch):
        temp = float(self.teacher_temp_schedule[epoch])
        loss, new_center = dino_loss_pallas(
            student_output, teacher_output, self.center, temp,
            ncrops=self.ncrops,
            student_temp=self.student_temp,
            center_momentum=self.center_momentum,
            tile_b=self.tile_b,
        )
        self.center = new_center   # buffer update, like register_buffer 'center'
        return loss


def _reference(student_output, teacher_output, center, temp,
               ncrops, student_temp, center_momentum):
    """Pure-numpy reference mirroring the PyTorch forward."""
    s = np.asarray(student_output, np.float32) / student_temp
    t = np.asarray(teacher_output, np.float32)
    c = np.asarray(center, np.float32)
    B = s.shape[0] // ncrops

    tt = (t - c) / temp
    tt = tt - tt.max(-1, keepdims=True)
    q = np.exp(tt) / np.exp(tt).sum(-1, keepdims=True)

    ss = s - s.max(-1, keepdims=True)
    logp = ss - np.log(np.exp(ss).sum(-1, keepdims=True))

    total, n = 0.0, 0
    for iq in range(2):
        qi = q[iq * B:(iq + 1) * B]
        for v in range(ncrops):
            if v == iq:
                continue
            lv = logp[v * B:(v + 1) * B]
            total += np.sum(-qi * lv, axis=-1).mean()
            n += 1
    loss = total / n
    batch_center = t.sum(0, keepdims=True) / t.shape[0]
    new_center = c * center_momentum + batch_center * (1 - center_momentum)
    return loss, new_center


if __name__ == "__main__":
    # Small shapes consistent with the module's forward:
    #   out_dim=128 (lane-dense), ncrops=4 (2 global + 2 local), batch=16 per crop.
    out_dim, ncrops, B = 128, 4, 16
    warmup_tt, tt, warmup_epochs, nepochs = 0.04, 0.07, 2, 5
    epoch = 1
    temp_val = float(np.concatenate((
        np.linspace(warmup_tt, tt, warmup_epochs),
        np.ones(nepochs - warmup_epochs) * tt))[epoch])

    key = jax.random.PRNGKey(0)
    k1, k2 = jax.random.split(key)
    student_output = jax.random.normal(k1, (ncrops * B, out_dim), jnp.float32)
    teacher_output = jax.random.normal(k2, (2 * B, out_dim), jnp.float32)

    # tile_b=8 -> 2 grid steps, exercises the tiled / parallel (dual-TC) path.
    loss_mod = DINOLossPallas(out_dim, ncrops, warmup_tt, tt, warmup_epochs,
                              nepochs, tile_b=8)
    center_before = loss_mod.center

    loss = loss_mod(student_output, teacher_output, epoch)
    loss = jax.block_until_ready(loss)
    new_center = jax.block_until_ready(loss_mod.center)

    ref_loss, ref_center = _reference(
        np.asarray(student_output), np.asarray(teacher_output),
        np.asarray(center_before), temp_val,
        ncrops, loss_mod.student_temp, loss_mod.center_momentum)
    np.testing.assert_allclose(np.asarray(loss), ref_loss, rtol=2e-5, atol=2e-5)
    np.testing.assert_allclose(np.asarray(new_center), ref_center, rtol=2e-5, atol=2e-5)

    # bf16-input smoke test (kernel upcasts per tile; auto tile sizing path).
    student_bf16 = student_output.astype(jnp.bfloat16)
    teacher_bf16 = teacher_output.astype(jnp.bfloat16)
    loss_b, center_b = dino_loss_pallas(
        student_bf16, teacher_bf16, center_before, temp_val,
        ncrops=ncrops, student_temp=loss_mod.student_temp,
        center_momentum=loss_mod.center_momentum)
    loss_b = jax.block_until_ready(loss_b)
    ref_loss_b, ref_center_b = _reference(
        np.asarray(student_bf16.astype(jnp.float32)),
        np.asarray(teacher_bf16.astype(jnp.float32)),
        np.asarray(center_before), temp_val,
        ncrops, loss_mod.student_temp, loss_mod.center_momentum)
    np.testing.assert_allclose(np.asarray(loss_b), ref_loss_b, rtol=1e-3, atol=1e-3)
    np.testing.assert_allclose(np.asarray(center_b), ref_center_b, rtol=1e-3, atol=1e-3)

    print("KERNEL_OK")
</pallas_src>

<mosaic_0001>
module attributes {stable_mosaic.version = 11 : i64} {
  func.func @_dino_loss_kernel(%arg0: i32, %arg1: memref<1x1xf32, #tpu.memory_space<smem>>, %arg2: memref<4x8x128xf32, #tpu.memory_space<vmem>>, %arg3: memref<2x8x128xf32, #tpu.memory_space<vmem>>, %arg4: memref<1x128xf32, #tpu.memory_space<vmem>>, %arg5: memref<1x1x128xf32, #tpu.memory_space<vmem>>, %arg6: memref<1x1x128xf32, #tpu.memory_space<vmem>>) attributes {dimension_semantics = [#tpu.dimension_semantics<parallel>], iteration_bounds = array<i64: 2>, scalar_prefetch = 0 : i64, scratch_operands = 0 : i64, tpu.core_type = #tpu.core_type<tc>, window_params = [{transform_indices = @transform_0, window_bounds = array<i64: 1, 1>}, {transform_indices = @transform_1, window_bounds = array<i64: 4, 8, 128>}, {transform_indices = @transform_2, window_bounds = array<i64: 2, 8, 128>}, {pipeline_mode = #tpu.pipeline_mode<synchronous>, transform_indices = @transform_3, window_bounds = array<i64: 1, 128>}, {transform_indices = @transform_4, window_bounds = array<i64: 1, 1, 128>}, {transform_indices = @transform_5, window_bounds = array<i64: 1, 1, 128>}]} {
    %c0 = arith.constant 0 : index
    %c0_0 = arith.constant 0 : index
    %0 = memref.load %arg1[%c0, %c0_0] : memref<1x1xf32, #tpu.memory_space<smem>>
    %cst = arith.constant 1.000000e+00 : f32
    %1 = arith.divf %cst, %0 : f32
    %c0_1 = arith.constant 0 : index
    %c0_2 = arith.constant 0 : index
    %2 = vector.load %arg4[%c0_1, %c0_2] : memref<1x128xf32, #tpu.memory_space<vmem>>, vector<1x128xf32>
    %c0_3 = arith.constant 0 : index
    %c0_4 = arith.constant 0 : index
    %c0_5 = arith.constant 0 : index
    %3 = vector.load %arg3[%c0_3, %c0_4, %c0_5] : memref<2x8x128xf32, #tpu.memory_space<vmem>>, vector<2x8x128xf32>
    %cst_6 = arith.constant dense<0.000000e+00> : vector<128xf32>
    %4 = vector.multi_reduction <add>, %3, %cst_6 [0, 1] : vector<2x8x128xf32> to vector<128xf32>
    %5 = vector.shape_cast %4 : vector<128xf32> to vector<1x1x128xf32>
    %c0_7 = arith.constant 0 : index
    %c0_8 = arith.constant 0 : index
    %c0_9 = arith.constant 0 : index
    %6 = vector.load %arg6[%c0_7, %c0_8, %c0_9] : memref<1x1x128xf32, #tpu.memory_space<vmem>>, vector<1x1x128xf32>
    tpu.vector_store %arg6[%c0_7, %c0_8, %c0_9], %5 {strides = array<i32>} : memref<1x1x128xf32, #tpu.memory_space<vmem>>, vector<1x1x128xf32>,
    %7 = vector.shape_cast %2 : vector<1x128xf32> to vector<1x1x128xf32>
    %8 = vector.broadcast %7 : vector<1x1x128xf32> to vector<2x8x128xf32>
    %9 = arith.subf %3, %8 : vector<2x8x128xf32>
    %10 = vector.broadcast %1 : f32 to vector<2x8x128xf32>
    %11 = arith.mulf %9, %10 : vector<2x8x128xf32>
    %cst_10 = arith.constant dense<0xFF800000> : vector<2x8xf32>
    %12 = vector.multi_reduction <maximumf>, %11, %cst_10 [2] : vector<2x8x128xf32> to vector<2x8xf32>
    %13 = vector.shape_cast %12 : vector<2x8xf32> to vector<2x8x1xf32>
    %14 = vector.broadcast %13 : vector<2x8x1xf32> to vector<2x8x128xf32>
    %15 = arith.subf %11, %14 : vector<2x8x128xf32>
    %16 = math.exp %15 : vector<2x8x128xf32>
    %cst_11 = arith.constant dense<0.000000e+00> : vector<2x8xf32>
    %17 = vector.multi_reduction <add>, %16, %cst_11 [2] : vector<2x8x128xf32> to vector<2x8xf32>
    %18 = vector.shape_cast %17 : vector<2x8xf32> to vector<2x8x1xf32>
    %19 = tpu.reciprocal %18 : vector<2x8x1xf32> -> vector<2x8x1xf32>
    %20 = vector.broadcast %19 : vector<2x8x1xf32> to vector<2x8x128xf32>
    %21 = arith.mulf %16, %20 : vector<2x8x128xf32>
    %22 = vector.extract_strided_slice %21 {offsets = [0, 0, 0], sizes = [1, 8, 128], strides = [1, 1, 1]} : vector<2x8x128xf32> to vector<1x8x128xf32>
    %23 = vector.shape_cast %22 : vector<1x8x128xf32> to vector<8x128xf32>
    %24 = vector.extract_strided_slice %21 {offsets = [1, 0, 0], sizes = [1, 8, 128], strides = [1, 1, 1]} : vector<2x8x128xf32> to vector<1x8x128xf32>
    %25 = vector.shape_cast %24 : vector<1x8x128xf32> to vector<8x128xf32>
    %26 = arith.addf %23, %25 : vector<8x128xf32>
    %cst_12 = arith.constant dense<0.000000e+00> : vector<8xf32>
    %27 = vector.multi_reduction <add>, %23, %cst_12 [1] : vector<8x128xf32> to vector<8xf32>
    %28 = vector.shape_cast %27 : vector<8xf32> to vector<8x1xf32>
    %cst_13 = arith.constant dense<0.000000e+00> : vector<8xf32>
    %29 = vector.multi_reduction <add>, %25, %cst_13 [1] : vector<8x128xf32> to vector<8xf32>
    %30 = vector.shape_cast %29 : vector<8xf32> to vector<8x1xf32>
    %31 = arith.addf %28, %30 : vector<8x1xf32>
    %cst_14 = arith.constant 0.000000e+00 : f32
    %32 = vector.broadcast %cst_14 : f32 to vector<8x1xf32>
    %cst_15 = arith.constant 0.000000e+00 : f32
    %33 = vector.broadcast %cst_15 : f32 to vector<8x1xf32>
    %c0_16 = arith.constant 0 : index
    %c0_17 = arith.constant 0 : index
    %c0_18 = arith.constant 0 : index
    %34 = vector.load %arg2[%c0_16, %c0_17, %c0_18] : memref<4x8x128xf32, #tpu.memory_space<vmem>>, vector<1x8x128xf32>
    %35 = vector.shape_cast %34 : vector<1x8x128xf32> to vector<8x128xf32>
    %cst_19 = arith.constant 1.000000e+01 : f32
    %36 = vector.broadcast %cst_19 : f32 to vector<8x128xf32>
    %37 = arith.mulf %35, %36 : vector<8x128xf32>
    %cst_20 = arith.constant dense<0xFF800000> : vector<8xf32>
    %38 = vector.multi_reduction <maximumf>, %37, %cst_20 [1] : vector<8x128xf32> to vector<8xf32>
    %39 = vector.shape_cast %38 : vector<8xf32> to vector<8x1xf32>
    %40 = vector.broadcast %39 : vector<8x1xf32> to vector<8x128xf32>
    %41 = arith.subf %37, %40 : vector<8x128xf32>
    %42 = math.exp %41 : vector<8x128xf32>
    %cst_21 = arith.constant dense<0.000000e+00> : vector<8xf32>
    %43 = vector.multi_reduction <add>, %42, %cst_21 [1] : vector<8x128xf32> to vector<8xf32>
    %44 = vector.shape_cast %43 : vector<8xf32> to vector<8x1xf32>
    %45 = math.log %44 : vector<8x1xf32>
    %46 = arith.mulf %26, %41 : vector<8x128xf32>
    %cst_22 = arith.constant dense<0.000000e+00> : vector<8xf32>
    %47 = vector.multi_reduction <add>, %46, %cst_22 [1] : vector<8x128xf32> to vector<8xf32>
    %48 = vector.shape_cast %47 : vector<8xf32> to vector<8x1xf32>
    %49 = arith.addf %33, %48 : vector<8x1xf32>
    %50 = arith.mulf %45, %31 : vector<8x1xf32>
    %51 = arith.subf %49, %50 : vector<8x1xf32>
    %52 = arith.mulf %23, %41 : vector<8x128xf32>
    %cst_23 = arith.constant dense<0.000000e+00> : vector<8xf32>
    %53 = vector.multi_reduction <add>, %52, %cst_23 [1] : vector<8x128xf32> to vector<8xf32>
    %54 = vector.shape_cast %53 : vector<8xf32> to vector<8x1xf32>
    %55 = arith.addf %32, %54 : vector<8x1xf32>
    %56 = arith.mulf %45, %28 : vector<8x1xf32>
    %57 = arith.subf %55, %56 : vector<8x1xf32>
    %c1 = arith.constant 1 : index
    %c0_24 = arith.constant 0 : index
    %c0_25 = arith.constant 0 : index
    %58 = vector.load %arg2[%c1, %c0_24, %c0_25] : memref<4x8x128xf32, #tpu.memory_space<vmem>>, vector<1x8x128xf32>
    %59 = vector.shape_cast %58 : vector<1x8x128xf32> to vector<8x128xf32>
    %cst_26 = arith.constant 1.000000e+01 : f32
    %60 = vector.broadcast %cst_26 : f32 to vector<8x128xf32>
    %61 = arith.mulf %59, %60 : vector<8x128xf32>
    %cst_27 = arith.constant dense<0xFF800000> : vector<8xf32>
    %62 = vector.multi_reduction <maximumf>, %61, %cst_27 [1] : vector<8x128xf32> to vector<8xf32>
    %63 = vector.shape_cast %62 : vector<8xf32> to vector<8x1xf32>
    %64 = vector.broadcast %63 : vector<8x1xf32> to vector<8x128xf32>
    %65 = arith.subf %61, %64 : vector<8x128xf32>
    %66 = math.exp %65 : vector<8x128xf32>
    %cst_28 = arith.constant dense<0.000000e+00> : vector<8xf32>
    %67 = vector.multi_reduction <add>, %66, %cst_28 [1] : vector<8x128xf32> to vector<8xf32>
    %68 = vector.shape_cast %67 : vector<8xf32> to vector<8x1xf32>
    %69 = math.log %68 : vector<8x1xf32>
    %70 = arith.mulf %26, %65 : vector<8x128xf32>
    %cst_29 = arith.constant dense<0.000000e+00> : vector<8xf32>
    %71 = vector.multi_reduction <add>, %70, %cst_29 [1] : vector<8x128xf32> to vector<8xf32>
    %72 = vector.shape_cast %71 : vector<8xf32> to vector<8x1xf32>
    %73 = arith.addf %51, %72 : vector<8x1xf32>
    %74 = arith.mulf %69, %31 : vector<8x1xf32>
    %75 = arith.subf %73, %74 : vector<8x1xf32>
    %76 = arith.mulf %25, %65 : vector<8x128xf32>
    %cst_30 = arith.constant dense<0.000000e+00> : vector<8xf32>
    %77 = vector.multi_reduction <add>, %76, %cst_30 [1] : vector<8x128xf32> to vector<8xf32>
    %78 = vector.shape_cast %77 : vector<8xf32> to vector<8x1xf32>
    %79 = arith.addf %57, %78 : vector<8x1xf32>
    %80 = arith.mulf %69, %30 : vector<8x1xf32>
    %81 = arith.subf %79, %80 : vector<8x1xf32>
    %c2 = arith.constant 2 : index
    %c0_31 = arith.constant 0 : index
    %c0_32 = arith.constant 0 : index
    %82 = vector.load %arg2[%c2, %c0_31, %c0_32] : memref<4x8x128xf32, #tpu.memory_space<vmem>>, vector<1x8x128xf32>
    %83 = vector.shape_cast %82 : vector<1x8x128xf32> to vector<8x128xf32>
    %cst_33 = arith.constant 1.000000e+01 : f32
    %84 = vector.broadcast %cst_33 : f32 to vector<8x128xf32>
    %85 = arith.mulf %83, %84 : vector<8x128xf32>
    %cst_34 = arith.constant dense<0xFF800000> : vector<8xf32>
    %86 = vector.multi_reduction <maximumf>, %85, %cst_34 [1] : vector<8x128xf32> to vector<8xf32>
    %87 = vector.shape_cast %86 : vector<8xf32> to vector<8x1xf32>
    %88 = vector.broadcast %87 : vector<8x1xf32> to vector<8x128xf32>
    %89 = arith.subf %85, %88 : vector<8x128xf32>
    %90 = math.exp %89 : vector<8x128xf32>
    %cst_35 = arith.constant dense<0.000000e+00> : vector<8xf32>
    %91 = vector.multi_reduction <add>, %90, %cst_35 [1] : vector<8x128xf32> to vector<8xf32>
    %92 = vector.shape_cast %91 : vector<8xf32> to vector<8x1xf32>
    %93 = math.log %92 : vector<8x1xf32>
    %94 = arith.mulf %26, %89 : vector<8x128xf32>
    %cst_36 = arith.constant dense<0.000000e+00> : vector<8xf32>
    %95 = vector.multi_reduction <add>, %94, %cst_36 [1] : vector<8x128xf32> to vector<8xf32>
    %96 = vector.shape_cast %95 : vector<8xf32> to vector<8x1xf32>
    %97 = arith.addf %75, %96 : vector<8x1xf32>
    %98 = arith.mulf %93, %31 : vector<8x1xf32>
    %99 = arith.subf %97, %98 : vector<8x1xf32>
    %c3 = arith.constant 3 : index
    %c0_37 = arith.constant 0 : index
    %c0_38 = arith.constant 0 : index
    %100 = vector.load %arg2[%c3, %c0_37, %c0_38] : memref<4x8x128xf32, #tpu.memory_space<vmem>>, vector<1x8x128xf32>
    %101 = vector.shape_cast %100 : vector<1x8x128xf32> to vector<8x128xf32>
    %cst_39 = arith.constant 1.000000e+01 : f32
    %102 = vector.broadcast %cst_39 : f32 to vector<8x128xf32>
    %103 = arith.mulf %101, %102 : vector<8x128xf32>
    %cst_40 = arith.constant dense<0xFF800000> : vector<8xf32>
    %104 = vector.multi_reduction <maximumf>, %103, %cst_40 [1] : vector<8x128xf32> to vector<8xf32>
    %105 = vector.shape_cast %104 : vector<8xf32> to vector<8x1xf32>
    %106 = vector.broadcast %105 : vector<8x1xf32> to vector<8x128xf32>
    %107 = arith.subf %103, %106 : vector<8x128xf32>
    %108 = math.exp %107 : vector<8x128xf32>
    %cst_41 = arith.constant dense<0.000000e+00> : vector<8xf32>
    %109 = vector.multi_reduction <add>, %108, %cst_41 [1] : vector<8x128xf32> to vector<8xf32>
    %110 = vector.shape_cast %109 : vector<8xf32> to vector<8x1xf32>
    %111 = math.log %110 : vector<8x1xf32>
    %112 = arith.mulf %26, %107 : vector<8x128xf32>
    %cst_42 = arith.constant dense<0.000000e+00> : vector<8xf32>
    %113 = vector.multi_reduction <add>, %112, %cst_42 [1] : vector<8x128xf32> to vector<8xf32>
    %114 = vector.shape_cast %113 : vector<8xf32> to vector<8x1xf32>
    %115 = arith.addf %99, %114 : vector<8x1xf32>
    %116 = arith.mulf %111, %31 : vector<8x1xf32>
    %117 = arith.subf %115, %116 : vector<8x1xf32>
    %118 = arith.subf %81, %117 : vector<8x1xf32>
    %119 = vector.shape_cast %118 : vector<8x1xf32> to vector<1x8x1xf32>
    %cst_43 = arith.constant dense<0.000000e+00> : vector<1xf32>
    %120 = vector.multi_reduction <add>, %119, %cst_43 [1, 2] : vector<1x8x1xf32> to vector<1xf32>
    %121 = vector.shape_cast %120 : vector<1xf32> to vector<1x1x1xf32>
    %122 = vector.extract %121[0, 0, 0] : f32 from vector<1x1x1xf32>
    %123 = vector.broadcast %122 : f32 to vector<1x1x128xf32>
    %c0_44 = arith.constant 0 : index
    %c0_45 = arith.constant 0 : index
    %c0_46 = arith.constant 0 : index
    %124 = vector.load %arg5[%c0_44, %c0_45, %c0_46] : memref<1x1x128xf32, #tpu.memory_space<vmem>>, vector<1x1x128xf32>
    tpu.vector_store %arg5[%c0_44, %c0_45, %c0_46], %123 {strides = array<i32>} : memref<1x1x128xf32, #tpu.memory_space<vmem>>, vector<1x1x128xf32>,
    return
  }
  func.func @transform_0(%arg0: i32) -> (i32, i32) {
    %c0_i32 = arith.constant 0 : i32
    %c0_i32_0 = arith.constant 0 : i32
    %c0_i32_1 = arith.constant 0 : i32
    return %c0_i32, %c0_i32_0 : i32, i32
  }
  func.func @transform_1(%arg0: i32) -> (i32, i32, i32) {
    %c0_i32 = arith.constant 0 : i32
    %c0_i32_0 = arith.constant 0 : i32
    %c0_i32_1 = arith.constant 0 : i32
    return %c0_i32, %arg0, %c0_i32_0 : i32, i32, i32
  }
  func.func @transform_2(%arg0: i32) -> (i32, i32, i32) {
    %c0_i32 = arith.constant 0 : i32
    %c0_i32_0 = arith.constant 0 : i32
    %c0_i32_1 = arith.constant 0 : i32
    return %c0_i32, %arg0, %c0_i32_0 : i32, i32, i32
  }
  func.func @transform_3(%arg0: i32) -> (i32, i32) {
    %c0_i32 = arith.constant 0 : i32
    %c0_i32_0 = arith.constant 0 : i32
    %c0_i32_1 = arith.constant 0 : i32
    return %c0_i32, %c0_i32_0 : i32, i32
  }
  func.func @transform_4(%arg0: i32) -> (i32, i32, i32) {
    %c0_i32 = arith.constant 0 : i32
    %c0_i32_0 = arith.constant 0 : i32
    %c0_i32_1 = arith.constant 0 : i32
    return %arg0, %c0_i32, %c0_i32_0 : i32, i32, i32
  }
  func.func @transform_5(%arg0: i32) -> (i32, i32, i32) {
    %c0_i32 = arith.constant 0 : i32
    %c0_i32_0 = arith.constant 0 : i32
    %c0_i32_1 = arith.constant 0 : i32
    return %arg0, %c0_i32, %c0_i32_0 : i32, i32, i32
  }
}

</mosaic_0001>

<bundles_post_ra>
// kernel: tpu_custom_call.1
= control target key start
LH: loop header
LB: loop body
LE: loop exit
PB: predicated region body
PF: predicated region fallthrough
CT: control target
= control target key end

     0   :  { %s1133_s0 = inlined_call_operand.<no memory space> [shape: f32[1,1], index: 0, kind: input, shape index: {}]   ;;  %s1134_s1 = inlined_call_operand.hbm [shape: f32[4,16,128], index: 1, kind: input, shape index: {}]   ;;  %s1135_s2 = inlined_call_operand.hbm [shape: f32[2,16,128], index: 2, kind: input, shape index: {}]   ;;  %s1136_s3 = inlined_call_operand.vmem [shape: f32[1,128], index: 3, kind: input, shape index: {}]   ;;  %s1137_s4 = inlined_call_operand.hbm [shape: f32[2,1,128], index: 4, kind: output, shape index: {0}]   ;;  %s1138_s5 = inlined_call_operand.hbm [shape: f32[2,1,128], index: 5, kind: output, shape index: {1}]  }
   0x1   :  { %1140 = sst [smem:[#allocation17_spill]] %s1134_s1 }
   0x2   :  { %11 = sst [smem:[#allocation2]] %s1133_s0 }
   0x3   :  { %12 = vsyncpa [#allocation4], 0 }
   0x4   :  { %14 = vsyncpa [#allocation4 + $0x1], 0 }
   0x5   :  { %15 = vsyncpa [#allocation7], 0 }
   0x6   :  { %17 = vsyncpa [#allocation7 + $0x1], 0 }
   0x7   :  { %18 = vsyncpa [#allocation5], 0 }
   0x8   :  { %20 = vsyncpa [#allocation5 + $0x1], 0 }
   0x9   :  { %21 = vsyncpa [#allocation10], 0 }
   0xa   :  { %23 = vsyncpa [#allocation10 + $0x1], 0  ;;  %s930_s20 = smov 0   ;;  %s932_s21 = smov 0  }
   0xb   :  { %s934_s22 = smov 0   ;;  %s936_s23 = smov 0  }
   0xc LB: > { %1141 = sst [smem:[#allocation15_spill]] %s888_s22  ;;  %s951_s0 = sadd.s32 4294967295, %s892_s23   ;;  %s892_s23 = sphi %s936_s23, %s1154_s23   ;;  %s888_s22 = sphi %s934_s22, %s1151_s22   ;;  %s884_s21 = sphi %s932_s21, %s1153_s21   ;;  %s880_s20 = sphi %s930_s20, %s1152_s20  }
   0xd   : > { %s625_s24 = sadd.s32 4294967294, %s892_s23   ;;  %s955_s25 = sadd.s32 1, %s892_s23  }
   0xe   : > { %s57_s26 = sadd.s32 1, %s888_s22  ;;  %s54_s27 = ssub.s32 %s892_s23, %s955_s25 }
   0xf   : > { %p64_p0 = scmp.ne.s32.totalorder %s888_s22, %s884_s21  ;;  %p55_p1 = scmp.eq.s32.totalorder %s54_s27, 0 }
  0x10   : > { %p65_p2 = scmp.eq.s32.totalorder %s892_s23, 0  ;;  %p70_p3 = scmp.ne.s32.totalorder %s884_s21, %s880_s20 }
  0x11   : > { %p71_p4 = scmp.eq.s32.totalorder %s951_s0, 0  ;;  %p141_p7 = scmp.eq.s32.totalorder %s951_s0, 1 }
  0x12   : > { %s967_s28 = scalar_select %p55_p1, %s888_s22, %s57_s26  }
  0x13   : > { %p969_p5 = por %p65_p2, %p64_p0  ;;  %p973_p6 = por %p71_p4, %p70_p3 }
  0x14   : > { %1142 = sst [smem:[#allocation16_spill]] %s967_s28  ;;  %p147_p8 = scmp.eq.s32.totalorder %s625_s24, 1 }
  0x15   : > { %p627_p9 = scmp.ge.s32.totalorder %s892_s23, 2  ;;  %p666_p10 = scmp.lt.s32.totalorder %s892_s23, 2 }
  0x16   : > { %p980_p11 = por %p141_p7, %p64_p0  ;;  %p984_p12 = por %p147_p8, %p70_p3 }
  0x17   : > { %s989_s8 = sand.u32 1, %s888_s22   ;;  %s629_s9 = sshll.u32 %s892_s23, 3 }
  0x18   : > { %s628_s10 = sshll.u32 %s989_s8, 5  ;;  %s1147_s1 = sld [smem:[#allocation17_spill]] }
  0x19   : > { %s203_s15 = scalar_lea.vmem [#allocation3], %s628_s10  ;;  %p1000_p13 = pnand %p666_p10, %p969_p5 }
  0x1a   : > { %s210_s16 = sshll.u32 %s203_s15, 4  ;;  %p632_p0 = scmp.ge.s32.totalorder %s892_s23, 1  ;;  %s211_s16 = int_to_ptr.vmem [resolvable:$true] %s210_s16 }
  0x1b   : > { %s200_s18 = scalar_lea.sflag [#allocation4], %s989_s8  ;;  %p734_p2 = pneg %p1000_p13 }
  0x1e   : > { %s207_s13 = scalar_lea.hbm %s1147_s1, %s629_s9  ;;  %s737_s29 = scalar_lea.hbm %s1147_s1, 64 }
  0x1f   : > { %s208_s14 = sshll.u32 %s207_s13, 4  ;;  %s209_s14 = int_to_ptr.hbm [resolvable:$true] %s208_s14 }
  0x20   : > { %s730_s19 = sshra.s32 %s209_s14, 4  ;;  %s731_s19 = int_to_ptr.hbm [resolvable:$true] %s730_s19 }
  0x21   : > { %s732_s24 = scalar_lea.hbm %s731_s19, 32  ;;  %p738_p5 = scmp.lt.s32.totalorder %s731_s19, %s1147_s1 }
  0x22   : > { %p733_p1 = scmp.ne.s32.totalorder %s731_s19, %s732_s24  ;;  %p739_p7 = scmp.lt.s32.totalorder %s737_s29, %s732_s24 }
  0x24   : > { %p735_p3 = pnand %p734_p2, %p733_p1  ;;  %p740_p8 = por %p739_p7, %p738_p5 }
  0x26   : > { %p736_p4 = pneg %p735_p3 }
  0x28   : > { %p741_p10 = pnand %p740_p8, %p736_p4 }
  0x2a   : > { %744 = shalt.err (!%p741_p10)
}
  0x2b   : > { %s894_s12 = smov 256   ;;  %s895_s13 = smov 128  }
  0x2c   : > { %s896_s15 = smov 8   ;;  %p239_p1 = scmp.lt.s32.totalorder %s892_s23, 3 }
  0x2d   : > { %655 = dma.hbm_to_vmem [thread:$0]  (!%p1000_p13), %s209_s14, 512, %s211_s16, %s200_s18, %s894_s12, %s895_s13, %s896_s15  }
  0x2e   : > { %s630_s19 = sshll.u32 %s989_s8, 4  ;;  %s228_s27 = scalar_lea.hbm %s1135_s2, %s629_s9 }
  0x2f   : > { %p1030_p3 = pnand %p632_p0, %p239_p1  ;;  %s229_s10 = sshll.u32 %s228_s27, 4  ;;  %s230_s10 = int_to_ptr.hbm [resolvable:$true] %s229_s10 }
  0x30   : > { %s224_s11 = scalar_lea.vmem [#allocation6], %s630_s19  ;;  %s221_s28 = scalar_lea.sflag [#allocation7], %s989_s8 }
  0x31   : > { %s231_s1 = sshll.u32 %s224_s11, 4  ;;  %s760_s22 = sshra.s32 %s230_s10, 4  ;;  %s232_s1 = int_to_ptr.vmem [resolvable:$true] %s231_s1  ;;  %s761_s22 = int_to_ptr.hbm [resolvable:$true] %s760_s22 }
  0x32   : > { %s762_s14 = scalar_lea.hbm %s761_s22, 16  ;;  %s767_s18 = scalar_lea.hbm %s1135_s2, 32 }
  0x33   : > { %p763_p4 = scmp.ne.s32.totalorder %s761_s22, %s762_s14  ;;  %p768_p0 = scmp.lt.s32.totalorder %s761_s22, %s1135_s2 }
  0x34   : > { %p769_p8 = scmp.lt.s32.totalorder %s767_s18, %s762_s14 }
  0x35   : > { %p765_p5 = pnand %p763_p4, %p734_p2 }
  0x36   : > { %p770_p10 = por %p769_p8, %p768_p0 }
  0x37   : > { %p766_p7 = pneg %p765_p5 }
  0x39   : > { %p771_p1 = pnand %p770_p10, %p766_p7 }
  0x3b   : > { %774 = shalt.err (!%p771_p1)
}
  0x3c   : > { %658 = dma.hbm_to_vmem [thread:$0]  (!%p1000_p13), %s230_s10, 256, %s232_s1, %s221_s28, %s894_s12, %s895_s13, %s896_s15  }
  0x3d   : > { %243 = sbr.rel (%p1030_p3) target bundleno = 742 (0x2e6), region = 36  ;;  %s1051_s8 = sand.u32 (!%p1030_p3), 1, %s884_s21  }
  0x3e   : > { %s633_s19 = sshll.u32 (!%p1030_p3), %s1051_s8, 5  ;;  %s246_s22 = scalar_lea.sflag (!%p1030_p3), [#allocation4], %s1051_s8 }
  0x3f   : > { %s1055_s27 = scalar_lea.vmem (!%p1030_p3), [#allocation3], %s633_s19 }
  0x42   : > { %863 = dma.done.wait (%p973_p6), %s246_s22, 512  }
  0x43   : > { %865 = vsyncadd (%p973_p6), %s246_s22, 4294966784  ;;  %s634_s1 = sshll.u32 %s1051_s8, 4  ;;  %s256_s28 = scalar_lea.sflag [#allocation7], %s1051_s8 }
  0x44   : > { %s259_s17 = scalar_lea.vmem [#allocation6], %s634_s1 }
  0x45   : > { %867 = dma.done.wait (%p973_p6), %s256_s28, 256  }
  0x46   : > { %869 = vsyncadd (%p973_p6), %s256_s28, 4294967040  ;;  %s295_s12 = sld [smem:[#allocation2]]  ;;  %v313_v11 = vld [vmem:[%s259_s17] sm:$0xff]  ;;  %v314_v12 = vld [vmem:[%s259_s17 + $0x8] sm:$0xff]  ;;  %vm465_vm12 = vcmask 7168   ;;  %s504_s11 = scalar_lea.hbm %s1138_s5, %s951_s0 }
  0x47   : > { %v1067_v13 = vadd.f32 %v314_v12, %v313_v11  ;;  %v703_v14 = vld [vmem:[%s1136_s3] ss:$0 sm:$0xff]  ;;  %v635_v22 = vld [vmem:[%s1055_s27 + $0x8] sm:$0xff]  ;;  %v636_v24 = vld [vmem:[%s1055_s27 + $0x10] sm:$0xff]  ;;  %s294_s14 = scalar_lea.vmem [#allocation9], %s1051_s8  ;;  %s508_s16 = sshll.u32 %s504_s11, 4  ;;  %s509_s16 = int_to_ptr.hbm [resolvable:$true] %s508_s16 }
  0x48   : > { %v326_v15 = vsub.f32 %v313_v11, %v703_v14  ;;  %v327_v18 = vsub.f32 %v314_v12, %v703_v14  ;;  %v381_v20 = vld [vmem:[%s1055_s27] sm:$0xff]  ;;  %v406_v23 = vmul.f32 10.0, %v635_v22  ;;  %v430_v25 = vmul.f32 10.0, %v636_v24  ;;  %v637_v34 = vld [vmem:[%s1055_s27 + $0x18] sm:$0xff]  ;;  %s506_s9 = sshll.u32 %s294_s14, 4  ;;  %s483_s18 = scalar_lea.sflag [#allocation10], %s1051_s8  ;;  %s507_s9 = int_to_ptr.vmem [resolvable:$true] %s506_s9 }
  0x49   : > { %v382_v21 = vmul.f32 10.0, %v381_v20  ;;  %v448_v35 = vmul.f32 10.0, %v637_v34  ;;  %s804_s24 = sshra.s32 %s509_s16, 4  ;;  %s810_s27 = scalar_lea.hbm %s1138_s5, 2  ;;  %s805_s24 = int_to_ptr.hbm [resolvable:$true] %s804_s24 }
  0x4a   : > { %s806_s26 = scalar_lea.hbm %s805_s24, 1  ;;  %p811_p3 = scmp.lt.s32.totalorder %s805_s24, %s1138_s5 }
  0x4b   : > { %383 = vmax.xlane.f32.xlu2 %v382_v21  ;;  %p807_p6 = scmp.ne.s32.totalorder %s805_s24, %s806_s26  ;;  %p812_p4 = scmp.lt.s32.totalorder %s810_s27, %s806_s26 }
  0x4c   : > { %v296_v0 = vstv %s295_s12 }
  0x4d   : > { %704 = vrcp.f32 %v296_v0  ;;  %v308_v3 = vand.u32 2147483648, %v296_v0  ;;  %vm302_vm0 = vweird.f32 %v296_v0  ;;  %v306_v5 = vand.u32 2147483647, %v296_v0  ;;  %p808_p13 = pnand %p807_p6, %p980_p11  ;;  %p813_p5 = por %p812_p4, %p811_p3 }
  0x4f   : > { %v309_v7 = vor.u32 1.1754944e-38, %v308_v3  ;;  %vm307_vm3 = vcmp.eq.f32.partialorder %v306_v5, 8.507059e+37  ;;  %p809_p2 = pneg %p808_p13 }
  0x51   : > { %p814_p7 = pnand %p813_p5, %p809_p2 }
  0x53   : > { %v705_v1 = vpop.eup %704  ;;  %407 = vmax.xlane.f32.xlu2 %v406_v23 }
  0x54   : > { %v298_v2 = vmul.f32 %v705_v1, %v296_v0  ;;  %vm303_vm1 = vweird.f32 %v705_v1 }
  0x55   : > { %vm304_vm2 = vmor %vm302_vm0, %vm303_vm1 }
  0x56   : > { %v299_v4 = vsub.f32 1.0, %v298_v2 }
  0x58   : > { %v300_v6 = vmul.f32 %v705_v1, %v299_v4 }
  0x5a   : > { %v301_v8 = vadd.f32 %v705_v1, %v300_v6 }
  0x5c   : > { %v305_v9 = vsel %vm304_vm2, %v705_v1, %v301_v8 }
  0x5d   : > { %v310_v10 = vsel %vm307_vm3, %v309_v7, %v305_v9 }
  0x5e   : > { %640 = vpush %v310_v10 }
  0x8f   : > { %s641_s15 = spop %640 }
  0x90   : > { %v328_v16 = vstv %s641_s15 }
  0x91   : > { %v329_v17 = vmul.f32 %v328_v16, %v326_v15  ;;  %v330_v19 = vmul.f32 %v328_v16, %v327_v18 }
  0x93   : > { %331 = vmax.xlane.f32.xlu0 %v329_v17 }
  0x9b   : > { %333 = vmax.xlane.f32.xlu0 %v330_v19 }
  0xa3   : > { %431 = vmax.xlane.f32.xlu0 %v430_v25 }
  0xbe   : > { %v384_v36 = vpop.xlane.xlu2 %383 }
  0xbf   : > { %v1076_v37 = vsub.f32 %v382_v21, %v384_v36 }
  0xc1   : > { %v386_v38 = vmul.f32 1.442695, %v1076_v37 }
  0xc6   : > { %v408_v39 = vpop.xlane.xlu2 %407 }
  0xc7   : > { %v409_v40 = vsub.f32 %v406_v23, %v408_v39 }
  0xc9   : > { %v410_v42 = vmul.f32 1.442695, %v409_v40 }
 0x106   : > { %v332_v26 = vpop.xlane.xlu0 %331 }
 0x107   : > { %v335_v27 = vsub.f32 %v329_v17, %v332_v26 }
 0x109   : > { %v337_v28 = vmul.f32 1.442695, %v335_v27 }
 0x10b   : > { %706 = vpow2.f32 %v337_v28 }
 0x10e   : > { %v334_v29 = vpop.xlane.xlu0 %333 }
 0x10f   : > { %v336_v30 = vsub.f32 %v330_v19, %v334_v29 }
 0x111   : > { %v707_v31 = vpop.eup %706  ;;  %v339_v32 = vmul.f32 1.442695, %v336_v30 }
 0x112   : > { %341 = vadd.xlane.f32.xlu1 %v707_v31 }
 0x113   : > { %708 = vpow2.f32 %v339_v32 }
 0x114   : > { %710 = vpow2.f32 %v386_v38 }
 0x115   : > { %712 = vpow2.f32 %v410_v42 }
 0x116   : > { %v432_v43 = vpop.xlane.xlu0 %431 }
 0x117   : > { %v433_v44 = vsub.f32 %v430_v25, %v432_v43 }
 0x119   : > { %v709_v33 = vpop.eup %708  ;;  %v434_v46 = vmul.f32 1.442695, %v433_v44 }
 0x11a   : > { %343 = vadd.xlane.f32.xlu1 %v709_v33  ;;  %v711_v41 = vpop.eup %710 }
 0x11b   : > { %388 = vadd.xlane.f32.xlu2 %v711_v41  ;;  %v713_v45 = vpop.eup %712  ;;  %714 = vpow2.f32 %v434_v46 }
 0x11c   : > { %412 = vadd.xlane.f32.xlu0 %v713_v45 }
 0x121   : > { %v715_v47 = vpop.eup %714 }
 0x122   : > { %449 = vmax.xlane.f32.xlu1 %v448_v35 }
 0x124   : > { %436 = vadd.xlane.f32.xlu0 %v715_v47 }
 0x185   : > { %v342_v48 = vpop.xlane.xlu1 %341 }
 0x186   : > { %716 = vrcp.f32 %v342_v48  ;;  %v356_v53 = vand.u32 2147483648, %v342_v48  ;;  %v354_v55 = vand.u32 2147483647, %v342_v48  ;;  %vm350_vm5 = vweird.f32 %v342_v48 }
 0x188   : > { %v357_v58 = vor.u32 1.1754944e-38, %v356_v53  ;;  %vm355_vm7 = vcmp.eq.f32.partialorder %v354_v55, 8.507059e+37 }
 0x18c   : > { %v717_v49 = vpop.eup %716 }
 0x18d   : > { %v346_v50 = vmul.f32 %v717_v49, %v342_v48  ;;  %v344_v51 = vpop.xlane.xlu1 %343  ;;  %vm351_vm4 = vweird.f32 %v717_v49 }
 0x18e   : > { %718 = vrcp.f32 %v344_v51  ;;  %vm352_vm6 = vmor %vm350_vm5, %vm351_vm4  ;;  %v370_v1 = vand.u32 2147483648, %v344_v51  ;;  %v368_v4 = vand.u32 2147483647, %v344_v51  ;;  %vm364_vm9 = vweird.f32 %v344_v51  ;;  %v389_v20 = vpop.xlane.xlu2 %388 }
 0x18f   : > { %v347_v52 = vsub.f32 1.0, %v346_v50  ;;  %v413_v21 = vpop.xlane.xlu0 %412 }
 0x190   : > { %v371_v6 = vor.u32 1.1754944e-38, %v370_v1  ;;  %vm369_vm11 = vcmp.eq.f32.partialorder %v368_v4, 8.507059e+37  ;;  %v316_v1 = vrot.slane %v1067_v13, 4 }
 0x191   : > { %v348_v54 = vmul.f32 %v717_v49, %v347_v52 }
 0x193   : > { %v349_v56 = vadd.f32 %v717_v49, %v348_v54 }
 0x194   : > { %v719_v57 = vpop.eup %718 }
 0x195   : > { %v360_v59 = vmul.f32 %v719_v57, %v344_v51  ;;  %v353_v60 = vsel %vm352_vm6, %v717_v49, %v349_v56  ;;  %v450_v61 = vpop.xlane.xlu1 %449  ;;  %vm365_vm8 = vweird.f32 %v719_v57 }
 0x196   : > { %v358_v62 = vsel %vm355_vm7, %v357_v58, %v353_v60  ;;  %v451_v2 = vsub.f32 %v448_v35, %v450_v61  ;;  %vm366_vm10 = vmor %vm364_vm9, %vm365_vm8 }
 0x197   : > { %v361_v63 = vsub.f32 1.0, %v360_v59  ;;  %v373_v0 = vmul.f32 %v707_v31, %v358_v62  ;;  %v437_v24 = vpop.xlane.xlu0 %436 }
 0x198   : > { %v452_v7 = vmul.f32 1.442695, %v451_v2 }
 0x199   : > { %v362_v3 = vmul.f32 %v719_v57, %v361_v63  ;;  %376 = vadd.xlane.f32.xlu1 %v373_v0  ;;  %v398_v18 = vmul.f32 %v1076_v37, %v373_v0 }
 0x19a   : > { %720 = vpow2.f32 %v452_v7 }
 0x19b   : > { %v363_v5 = vadd.f32 %v719_v57, %v362_v3  ;;  %722 = vlog2.f32 %v389_v20  ;;  %v317_v3 = vadd.f32 %v316_v1, %v1067_v13 }
 0x19c   : > { %724 = vlog2.f32 %v413_v21 }
 0x19d   : > { %v367_v8 = vsel %vm366_vm10, %v719_v57, %v363_v5  ;;  %726 = vlog2.f32 %v437_v24  ;;  %v318_v4 = vrot.slane %v317_v3, 2 }
 0x19e   : > { %v372_v9 = vsel %vm369_vm11, %v371_v6, %v367_v8 }
 0x19f   : > { %v374_v10 = vmul.f32 %v709_v33, %v372_v9  ;;  %v319_v5 = vadd.f32 %v318_v4, %v317_v3 }
 0x1a0   : > { %v721_v15 = vpop.eup %720 }
 0x1a1   : > { %378 = vadd.xlane.f32.xlu2 %v374_v10  ;;  %v375_v11 = vadd.f32 %v374_v10, %v373_v0  ;;  %v422_v17 = vmul.f32 %v409_v40, %v374_v10  ;;  %v723_v23 = vpop.eup %722  ;;  %v320_v6 = vrot.slane %v319_v5, 1 }
 0x1a2   : > { %v391_v26 = vmul.f32 0.6931472, %v723_v23  ;;  %v725_v31 = vpop.eup %724 }
 0x1a3   : > { %v392_v12 = vmul.f32 %v1076_v37, %v375_v11  ;;  %v416_v14 = vmul.f32 %v409_v40, %v375_v11  ;;  %v440_v16 = vmul.f32 %v433_v44, %v375_v11  ;;  %v458_v19 = vmul.f32 %v451_v2, %v375_v11  ;;  %v727_v36 = vpop.eup %726 }
 0x1a4   : > { %v415_v34 = vmul.f32 0.6931472, %v725_v31  ;;  %v439_v39 = vmul.f32 0.6931472, %v727_v36  ;;  %v321_v7 = vadd.f32 %v320_v6, %v319_v5 }
 0x1a5   : > { %393 = vadd.xlane.f32.xlu1 %v392_v12  ;;  %417 = vadd.xlane.f32.xlu0 %v416_v14 }
 0x1a6   : > { %322 = vst [vmem:[%s294_s14] sm:$0x1] %v321_v7 }
 0x1a9   : > { %454 = vadd.xlane.f32.xlu2 %v721_v15 }
 0x1ad   : > { %441 = vadd.xlane.f32.xlu1 %v440_v16  ;;  %423 = vadd.xlane.f32.xlu0 %v422_v17 }
 0x1b1   : > { %399 = vadd.xlane.f32.xlu2 %v398_v18 }
 0x1b5   : > { %459 = vadd.xlane.f32.xlu1 %v458_v19 }
 0x20c   : > { %v377_v22 = vpop.xlane.xlu1 %376 }
 0x20d   : > { %v402_v42 = vmul.f32 %v391_v26, %v377_v22 }
 0x214   : > { %v379_v25 = vpop.xlane.xlu2 %378 }
 0x215   : > { %v380_v27 = vadd.f32 %v379_v25, %v377_v22  ;;  %v426_v52 = vmul.f32 %v415_v34, %v379_v25 }
 0x217   : > { %v396_v28 = vmul.f32 %v391_v26, %v380_v27  ;;  %v420_v37 = vmul.f32 %v415_v34, %v380_v27  ;;  %v444_v47 = vmul.f32 %v439_v39, %v380_v27 }
 0x218   : > { %v394_v29 = vpop.xlane.xlu1 %393  ;;  %v418_v32 = vpop.xlane.xlu0 %417 }
 0x219   : > { %v397_v30 = vsub.f32 %v394_v29, %v396_v28 }
 0x21b   : > { %v419_v35 = vadd.f32 %v418_v32, %v397_v30 }
 0x21c   : > { %v455_v33 = vpop.xlane.xlu2 %454 }
 0x21d   : > { %728 = vlog2.f32 %v455_v33  ;;  %v421_v40 = vsub.f32 %v419_v35, %v420_v37 }
 0x220   : > { %v442_v38 = vpop.xlane.xlu1 %441  ;;  %v424_v48 = vpop.xlane.xlu0 %423 }
 0x221   : > { %v443_v43 = vadd.f32 %v442_v38, %v421_v40 }
 0x223   : > { %v729_v41 = vpop.eup %728  ;;  %v445_v50 = vsub.f32 %v443_v43, %v444_v47 }
 0x224   : > { %v400_v44 = vpop.xlane.xlu2 %399  ;;  %v457_v45 = vmul.f32 0.6931472, %v729_v41 }
 0x225   : > { %v403_v46 = vsub.f32 %v400_v44, %v402_v42 }
 0x226   : > { %v462_v53 = vmul.f32 %v457_v45, %v380_v27 }
 0x227   : > { %v425_v49 = vadd.f32 %v424_v48, %v403_v46 }
 0x228   : > { %v460_v51 = vpop.xlane.xlu1 %459 }
 0x229   : > { %v461_v54 = vadd.f32 %v460_v51, %v445_v50  ;;  %v427_v56 = vsub.f32 %v425_v49, %v426_v52 }
 0x22b   : > { %v463_v55 = vsub.f32 %v461_v54, %v462_v53 }
 0x22d   : > { %v464_v57 = vsub.f32 %v427_v56, %v463_v55 }
 0x22f   : > { %v466_v58 = vsel %vm465_vm12, %v464_v57, 0.0 }
 0x230   : > { %467 = vadd.xlane.f32.xlu2 %v466_v58 }
 0x2a3   : > { %v468_v59 = vpop.xlane.xlu2 %467 }
 0x2a4   : > { %v469_v60 = vrot.slane %v468_v59, 4 }
 0x2a6   : > { %v470_v61 = vadd.f32 %v469_v60, %v468_v59 }
 0x2a8   : > { %v471_v62 = vrot.slane %v470_v61, 2 }
 0x2aa   : > { %v472_v63 = vadd.f32 %v471_v62, %v470_v61 }
 0x2ac   : > { %v473_v0 = vrot.slane %v472_v63, 1 }
 0x2ae   : > { %v474_v2 = vadd.f32 %v473_v0, %v472_v63 }
 0x2b0   : > { %642 = vpush %v474_v2 }
 0x2b1   : > { %817 = shalt.err (!%p814_p7)
}
 0x2b2   : > { %649 = dma.vmem_to_hbm [thread:$0]  (%p980_p11), %s507_s9, 16, %s509_s16, %s483_s18  }
 0x2b3   : > { %s491_s30 = scalar_lea.hbm %s1137_s4, %s951_s0  ;;  %s288_s13 = scalar_lea.vmem [#allocation8], %s1051_s8 }
 0x2b4   : > { %s493_s15 = sshll.u32 %s288_s13, 4  ;;  %s495_s29 = sshll.u32 %s491_s30, 4  ;;  %s494_s15 = int_to_ptr.vmem [resolvable:$true] %s493_s15  ;;  %s496_s29 = int_to_ptr.hbm [resolvable:$true] %s495_s29 }
 0x2b5   : > { %s479_s11 = scalar_lea.sflag [#allocation5], %s1051_s8  ;;  %s832_s14 = sshra.s32 %s496_s29, 4  ;;  %s833_s14 = int_to_ptr.hbm [resolvable:$true] %s832_s14 }
 0x2b6   : > { %s834_s24 = scalar_lea.hbm %s833_s14, 1  ;;  %s838_s0 = scalar_lea.hbm %s1137_s4, 2 }
 0x2b7   : > { %p835_p0 = scmp.ne.s32.totalorder %s833_s14, %s834_s24  ;;  %p839_p1 = scmp.lt.s32.totalorder %s833_s14, %s1137_s4 }
 0x2b8   : > { %p840_p6 = scmp.lt.s32.totalorder %s838_s0, %s834_s24 }
 0x2b9   : > { %p836_p8 = pnand %p835_p0, %p980_p11 }
 0x2ba   : > { %p841_p13 = por %p840_p6, %p839_p1 }
 0x2bb   : > { %p837_p10 = pneg %p836_p8 }
 0x2bd   : > { %p842_p2 = pnand %p841_p13, %p837_p10 }
 0x2e1   : > { %s643_s10 = spop %642 }
 0x2e2   : > { %v476_v13 = vstv %s643_s10 }
 0x2e3   : > { %477 = vst [vmem:[%s288_s13] sm:$0x1] %v476_v13 }
 0x2e4   : > { %845 = shalt.err (!%p842_p2)
}
 0x2e5   : > { %648 = dma.vmem_to_hbm [thread:$0]  (%p980_p11), %s494_s15, 16, %s496_s29, %s479_s11  }
 0x2e6 PF: > { %s520_s8 = sand.u32 1, %s880_s20   ;;  %p660_p3 = pnand %p627_p9, %p984_p12 }
 0x2e7   : > { %s521_s19 = scalar_lea.sflag [#allocation5], %s520_s8 }
 0x2e8   : > { %p661_p4 = pneg %p660_p3 }
 0x2ea   : > { %871 = dma.done.wait (%p661_p4), %s521_s19, 16  }
 0x2eb   : > { %873 = vsyncadd (%p661_p4), %s521_s19, 4294967280  ;;  %s530_s22 = scalar_lea.sflag [#allocation10], %s520_s8 }
 0x2ec   : > { %875 = dma.done.wait (%p661_p4), %s530_s22, 16  }
 0x2ed   : > { %877 = vsyncadd (%p661_p4), %s530_s22, 4294967280  ;;  %s1150_s27 = sld [smem:[#allocation15_spill]]  ;;  %p26_p11 = scmp.ge.s32.totalorder %s955_s25, 4  }
 0x2ee   : > { %s1151_s22 = sld [smem:[#allocation16_spill]]  ;;  %s1152_s20 = smov %s884_s21 }
 0x2ef   : > { %s1154_s23 = smov %s955_s25  ;;  %28 = sbr.rel (!%p26_p11) target bundleno = 12 (0xc), region = 114 }
 0x2f3   : > { %s1153_s21 = smov %s1150_s27 }
 0x2f4   :  { %535 = vsyncpa [#allocation4], 1 }
 0x2f5   :  { %537 = vsyncpa [#allocation4 + $0x1], 1 }
 0x2f6   :  { %538 = vsyncpa [#allocation7], 1 }
 0x2f7   :  { %540 = vsyncpa [#allocation7 + $0x1], 1 }
 0x2f8   :  { %541 = vsyncpa [#allocation5], 1 }
 0x2f9   :  { %543 = vsyncpa [#allocation5 + $0x1], 1 }
 0x2fa   :  { %544 = vsyncpa [#allocation10], 1 }
 0x2fb   :  { %546 = vsyncpa [#allocation10 + $0x1], 1 }

</bundles_post_ra>
